<compile_context>
chip_gen: v7x
topology: tpu7x:2x2x1
jax: 0.10.0
libtpu: 0.0.40
codegen_flags: <defaults>
</compile_context>

<pallas_src>
import functools
import math

import jax
import jax.numpy as jnp
from jax.experimental import pallas as pl
from jax.experimental.pallas import tpu as pltpu

_SQRT_HALF = 0.7071067811865476  # 1/sqrt(2)


def _round_up(x, m):
    return ((x + m - 1) // m) * m


def _vmem_capacity_bytes():
    """Physical VMEM per TensorCore (64 MiB on v7x, 128 MiB on v5e/v6e)."""
    try:
        info = pltpu.get_tpu_info()
        cap = getattr(info, "vmem_capacity_bytes", None)
        if cap:
            return int(cap)
    except Exception:
        pass
    return 128 << 20


def _pick_row_tile(M, tm_pref):
    """Choose (tm_eff, Mp).

    Prefers tiles that (a) satisfy the sublane rule (multiple of 8, or equal to
    the full row count), (b) divide M exactly so no wrapper-side pad/copy of x is
    needed, and (c) leave >= 2 row tiles so the 'parallel' row axis can be split
    across TensorCores (v7x megacore).
    """
    if M <= 8 or (M % 8 != 0 and M <= tm_pref):
        return M, M                                # single full-extent tile, no padding
    Mq = _round_up(M, 8)
    upper = min(tm_pref, Mq // 2 if Mq >= 16 else Mq)
    upper = max(8, upper - upper % 8)
    if M % 8 == 0:
        c = upper
        while c >= 8:
            if M % c == 0:
                if c >= min(64, upper):
                    return c, M                    # divides exactly: no padding
                break
            c -= 8
    # Ragged fallback: pad rows up to a multiple of the preferred tile.
    return upper, _round_up(Mq, upper)


def _apply_activation(h, activation):
    if activation == "gelu":
        # Exact erf-based GELU (nn.GELU default); constant multiply, no divide.
        return 0.5 * h * (1.0 + jax.lax.erf(h * _SQRT_HALF))
    return jnp.maximum(h, 0.0)                     # relu


# ---------------------------------------------------------------------------
# Kernels
# ---------------------------------------------------------------------------

def _ffn_resident_kernel(x_ref, w1_ref, b1_ref, w2_ref, b2_ref, o_ref, *, activation):
    """Weight-stationary path.  grid = (row tiles,).

    W1/W2/biases use constant index maps so Pallas keeps them resident in VMEM
    across row tiles; only the x / out row tiles stream from HBM.
    """
    h = jnp.dot(x_ref[...], w1_ref[...], preferred_element_type=jnp.float32)
    h = _apply_activation(h + b1_ref[...], activation)
    o = jnp.dot(h.astype(w2_ref.dtype), w2_ref[...],
                preferred_element_type=jnp.float32)
    o_ref[...] = (o + b2_ref[...]).astype(o_ref.dtype)


def _chunked_step(x_ref, w1_ref, b1_ref, w2_ref, acc_ref, activation):
    @pl.when(pl.program_id(1) == 0)
    def _():
        acc_ref[...] = jnp.zeros_like(acc_ref)

    h = jnp.dot(x_ref[...], w1_ref[...], preferred_element_type=jnp.float32)
    h = _apply_activation(h + b1_ref[...], activation)
    acc_ref[...] += jnp.dot(h.astype(w2_ref.dtype), w2_ref[...],
                            preferred_element_type=jnp.float32)


def _ffn_chunked_inplace_kernel(x_ref, w1_ref, b1_ref, w2_ref, b2_ref, o_ref, *, activation):
    """Chunked-reduction path, f32 output: the output block itself is the f32
    accumulator (no scratch, no final copy).  grid = (row tiles, ff chunks)."""
    _chunked_step(x_ref, w1_ref, b1_ref, w2_ref, o_ref, activation)

    @pl.when(pl.program_id(1) == pl.num_programs(1) - 1)
    def _():
        o_ref[...] += b2_ref[...]


def _ffn_chunked_scratch_kernel(x_ref, w1_ref, b1_ref, w2_ref, b2_ref, o_ref,
                                acc_ref, *, activation):
    """Chunked-reduction path, non-f32 output: accumulate in a f32 VMEM scratch
    and cast into the output block on the last ff chunk."""
    _chunked_step(x_ref, w1_ref, b1_ref, w2_ref, acc_ref, activation)

    @pl.when(pl.program_id(1) == pl.num_programs(1) - 1)
    def _():
        o_ref[...] = (acc_ref[...] + b2_ref[...]).astype(o_ref.dtype)


# ---------------------------------------------------------------------------
# Wrapper
# ---------------------------------------------------------------------------

def feed_forward(x, w1, b1, w2, b2, *, activation="gelu",
                 compute_dtype=jnp.bfloat16, tm=None, tk=None,
                 force_chunked=False):
    """x: [B, S, dim]; w1: [dim, ff_dim]; b1: [ff_dim]; w2: [ff_dim, dim]; b2: [dim].

    Weights are stored (in, out) so the kernel computes x @ W directly.  Dropout
    is eval-mode identity.  `compute_dtype` selects the MXU input dtype (bf16 by
    default — full MXU rate + half the weight HBM bytes); accumulation, biases
    and the activation stay in f32 and the output is cast back to x.dtype.
    """
    if activation not in ("gelu", "relu"):
        raise ValueError(f"Unsupported activation: {activation}")

    B, S, dim = x.shape
    ff_dim = w1.shape[1]
    out_dtype = jnp.dtype(x.dtype)
    cdt = jnp.dtype(compute_dtype) if compute_dtype is not None else out_dtype
    bpe = cdt.itemsize
    obpe = out_dtype.itemsize
    M = B * S

    # --- generation-aware budgets / tile preferences -----------------------
    cap = _vmem_capacity_bytes()
    if cap <= (80 << 20):                          # v7x-class: 64 MiB VMEM per TC
        vmem_ceiling = 52 << 20
        tm_pref = tm or (128 if dim >= 4096 else 256)
        tk_pref = tk or (256 if dim >= 4096 else 512)
    else:                                          # v5e / v6e: 128 MiB VMEM
        vmem_ceiling = 100 << 20
        tm_pref = tm or (256 if dim >= 4096 else 512)
        tk_pref = tk or (512 if dim >= 4096 else 1024)
    vmem_ceiling = min(vmem_ceiling, cap - (8 << 20))

    tm_eff, Mp = _pick_row_tile(M, tm_pref)
    row_tiles = Mp // tm_eff

    x_flat = x.reshape(M, dim)
    if cdt != out_dtype:
        x_flat = x_flat.astype(cdt)
    if Mp != M:
        # Ragged fallback only; _pick_row_tile avoids this in the common case.
        x_flat = jnp.pad(x_flat, ((0, Mp - M), (0, 0)))

    w1c = w1.astype(cdt)
    w2c = w2.astype(cdt)
    b1f = b1.astype(jnp.float32)
    b2_2d = b2.astype(jnp.float32).reshape(1, dim)

    flops = 4 * Mp * dim * ff_dim                  # two matmuls, 2 flops / MAC
    transcendentals = Mp * ff_dim if activation == "gelu" else 0

    # --- weight-stationary fast-path decision -------------------------------
    Fp_res = _round_up(ff_dim, 128)
    est_res = (4 * dim * Fp_res * bpe              # W1+W2 (double-buffered, conservative)
               + 4 * (Fp_res + dim) * 4            # biases (double-buffered f32)
               + 2 * tm_eff * dim * (bpe + obpe)   # x / out row tiles (double-buffered)
               + 2 * tm_eff * Fp_res * 4)          # f32 h intermediate + headroom
    use_resident = (not force_chunked) and est_res <= (vmem_ceiling - (4 << 20))

    if use_resident:
        Fp = Fp_res
        if Fp != ff_dim:
            # Hidden-axis zero padding is inert: gelu(0)=relu(0)=0 and the padded
            # W2 rows are zero.
            w1c = jnp.pad(w1c, ((0, 0), (0, Fp - ff_dim)))
            b1f = jnp.pad(b1f, ((0, Fp - ff_dim),))
            w2c = jnp.pad(w2c, ((0, Fp - ff_dim), (0, 0)))
        b1_2d = b1f.reshape(1, Fp)

        vmem_limit = int(min(max(est_res * 5 // 4 + (2 << 20), 16 << 20), vmem_ceiling))
        cost = pl.CostEstimate(
            flops=flops, transcendentals=transcendentals,
            bytes_accessed=(Mp * dim * bpe + 2 * dim * Fp * bpe
                            + (Fp + dim) * 4 + Mp * dim * obpe))

        out_flat = pl.pallas_call(
            functools.partial(_ffn_resident_kernel, activation=activation),
            out_shape=jax.ShapeDtypeStruct((Mp, dim), out_dtype),
            grid_spec=pltpu.PrefetchScalarGridSpec(
                num_scalar_prefetch=0,
                grid=(row_tiles,),
                in_specs=[
                    pl.BlockSpec((tm_eff, dim), lambda i: (i, 0)),   # x row tile
                    pl.BlockSpec((dim, Fp), lambda i: (0, 0)),       # W1 (resident)
                    pl.BlockSpec((1, Fp), lambda i: (0, 0)),         # b1 (resident)
                    pl.BlockSpec((Fp, dim), lambda i: (0, 0)),       # W2 (resident)
                    pl.BlockSpec((1, dim), lambda i: (0, 0)),        # b2 (resident)
                ],
                out_specs=pl.BlockSpec((tm_eff, dim), lambda i: (i, 0)),
            ),
            compiler_params=pltpu.CompilerParams(
                dimension_semantics=("parallel",),
                vmem_limit_bytes=vmem_limit,
            ),
            cost_estimate=cost,
        )(x_flat, w1c, b1_2d, w2c, b2_2d)
    else:
        # Chunked-reduction fallback: stream ff_dim chunks of W1/W2 per row tile.
        tk_eff = min(tk_pref, _round_up(ff_dim, 128))
        Fp = _round_up(ff_dim, tk_eff)
        if Fp != ff_dim:
            w1c = jnp.pad(w1c, ((0, 0), (0, Fp - ff_dim)))
            b1f = jnp.pad(b1f, ((0, Fp - ff_dim),))
            w2c = jnp.pad(w2c, ((0, Fp - ff_dim), (0, 0)))
        b1_2d = b1f.reshape(1, Fp)

        use_out_acc = out_dtype == jnp.dtype(jnp.float32)
        est = (2 * (tm_eff * dim * bpe + dim * tk_eff * bpe + tk_eff * 4
                    + tk_eff * dim * bpe + dim * 4 + tm_eff * dim * obpe)
               + (0 if use_out_acc else tm_eff * dim * 4)
               + 2 * tm_eff * tk_eff * 4)
        vmem_limit = int(min(max(est * 5 // 4 + (2 << 20), 16 << 20), vmem_ceiling))
        cost = pl.CostEstimate(
            flops=flops, transcendentals=transcendentals,
            bytes_accessed=(Mp * dim * bpe + row_tiles * 2 * dim * Fp * bpe
                            + (Fp + dim) * 4 + Mp * dim * obpe))

        if use_out_acc:
            kernel = functools.partial(_ffn_chunked_inplace_kernel, activation=activation)
            scratch_shapes = []
        else:
            kernel = functools.partial(_ffn_chunked_scratch_kernel, activation=activation)
            scratch_shapes = [pltpu.VMEM((tm_eff, dim), jnp.float32)]

        out_flat = pl.pallas_call(
            kernel,
            out_shape=jax.ShapeDtypeStruct((Mp, dim), out_dtype),
            grid_spec=pltpu.PrefetchScalarGridSpec(
                num_scalar_prefetch=0,
                grid=(row_tiles, Fp // tk_eff),
                in_specs=[
                    pl.BlockSpec((tm_eff, dim), lambda i, k: (i, 0)),   # x row tile
                    pl.BlockSpec((dim, tk_eff), lambda i, k: (0, k)),   # W1 column chunk
                    pl.BlockSpec((1, tk_eff), lambda i, k: (0, k)),     # b1 chunk
                    pl.BlockSpec((tk_eff, dim), lambda i, k: (k, 0)),   # W2 row chunk
                    pl.BlockSpec((1, dim), lambda i, k: (0, 0)),        # b2
                ],
                out_specs=pl.BlockSpec((tm_eff, dim), lambda i, k: (i, 0)),
                scratch_shapes=scratch_shapes,
            ),
            compiler_params=pltpu.CompilerParams(
                dimension_semantics=("parallel", "arbitrary"),
                vmem_limit_bytes=vmem_limit,
            ),
            cost_estimate=cost,
        )(x_flat, w1c, b1_2d, w2c, b2_2d)

    if Mp != M:
        out_flat = out_flat[:M]
    return out_flat.reshape(B, S, dim)


def init_params(key, dim, ff_dim, dtype=jnp.float32):
    """Deterministic init matching nn.Linear's default (kaiming-uniform-ish)."""
    k1, k2, k3, k4 = jax.random.split(key, 4)
    bound1 = 1.0 / math.sqrt(dim)
    bound2 = 1.0 / math.sqrt(ff_dim)
    # Stored as (in, out) so the kernel does x @ W directly.
    w1 = jax.random.uniform(k1, (dim, ff_dim), dtype, -bound1, bound1)
    b1 = jax.random.uniform(k2, (ff_dim,), dtype, -bound1, bound1)
    w2 = jax.random.uniform(k3, (ff_dim, dim), dtype, -bound2, bound2)
    b2 = jax.random.uniform(k4, (dim,), dtype, -bound2, bound2)
    return w1, b1, w2, b2


if __name__ == "__main__":
    dim, ff_dim = 128, 512          # module defaults
    B, S = 2, 8                     # small batch/seq

    key = jax.random.PRNGKey(0)
    kx, kp = jax.random.split(key)
    x = jax.random.normal(kx, (B, S, dim), jnp.float32)
    w1, b1, w2, b2 = init_params(kp, dim, ff_dim)

    # Reference in plain JAX (exact erf GELU, dropout = identity in eval mode).
    h_ref = x.reshape(-1, dim) @ w1 + b1
    h_ref = 0.5 * h_ref * (1.0 + jax.lax.erf(h_ref * _SQRT_HALF))
    o_ref = (h_ref @ w2 + b2).reshape(B, S, dim)

    # f32 MXU path (weight-resident): tight tolerance.
    out_f32 = jax.block_until_ready(
        feed_forward(x, w1, b1, w2, b2, compute_dtype=jnp.float32))
    assert jnp.allclose(out_f32, o_ref, atol=1e-5, rtol=1e-5), "f32 resident mismatch"

    # Default bf16 MXU path (weight-resident), f32 accumulation: relaxed tolerance.
    out_bf16 = jax.block_until_ready(feed_forward(x, w1, b1, w2, b2))
    assert jnp.allclose(out_bf16, o_ref, atol=5e-2, rtol=5e-2), "bf16 resident mismatch"

    # Forced chunked-reduction path, f32 output-as-accumulator (4 ff chunks).
    out_chunk = jax.block_until_ready(
        feed_forward(x, w1, b1, w2, b2, compute_dtype=jnp.float32,
                     tk=128, force_chunked=True))
    assert jnp.allclose(out_chunk, o_ref, atol=1e-5, rtol=1e-5), "f32 chunked mismatch"

    # Forced chunked-reduction path, bf16 output -> f32 scratch accumulator variant.
    x_bf16 = x.astype(jnp.bfloat16)
    out_chunk_bf16 = jax.block_until_ready(
        feed_forward(x_bf16, w1, b1, w2, b2, tk=128, force_chunked=True))
    assert jnp.allclose(out_chunk_bf16.astype(jnp.float32), o_ref,
                        atol=5e-2, rtol=5e-2), "bf16 chunked mismatch"

    print("KERNEL_OK")
</pallas_src>

<mosaic_0001>
module attributes {stable_mosaic.version = 11 : i64} {
  func.func @_ffn_resident_kernel(%arg0: i32, %arg1: memref<8x128xf32, #tpu.memory_space<vmem>>, %arg2: memref<128x512xf32, #tpu.memory_space<vmem>>, %arg3: memref<1x512xf32, #tpu.memory_space<vmem>>, %arg4: memref<512x128xf32, #tpu.memory_space<vmem>>, %arg5: memref<1x128xf32, #tpu.memory_space<vmem>>, %arg6: memref<8x128xf32, #tpu.memory_space<vmem>>) attributes {dimension_semantics = [#tpu.dimension_semantics<parallel>], iteration_bounds = array<i64: 2>, scalar_prefetch = 0 : i64, scratch_operands = 0 : i64, tpu.core_type = #tpu.core_type<tc>, window_params = [{transform_indices = @transform_0, window_bounds = array<i64: 8, 128>}, {pipeline_mode = #tpu.pipeline_mode<synchronous>, transform_indices = @transform_1, window_bounds = array<i64: 128, 512>}, {pipeline_mode = #tpu.pipeline_mode<synchronous>, transform_indices = @transform_2, window_bounds = array<i64: 1, 512>}, {pipeline_mode = #tpu.pipeline_mode<synchronous>, transform_indices = @transform_3, window_bounds = array<i64: 512, 128>}, {pipeline_mode = #tpu.pipeline_mode<synchronous>, transform_indices = @transform_4, window_bounds = array<i64: 1, 128>}, {transform_indices = @transform_5, window_bounds = array<i64: 8, 128>}]} {
    %c0 = arith.constant 0 : index
    %c0_0 = arith.constant 0 : index
    %0 = vector.load %arg1[%c0, %c0_0] : memref<8x128xf32, #tpu.memory_space<vmem>>, vector<8x128xf32>
    %c0_1 = arith.constant 0 : index
    %c0_2 = arith.constant 0 : index
    %1 = vector.load %arg2[%c0_1, %c0_2] : memref<128x512xf32, #tpu.memory_space<vmem>>, vector<128x512xf32>
    %cst = arith.constant dense<0.000000e+00> : vector<8x512xf32>
    %2 = tpu.matmul %0, %1, %cst {dimension_numbers = #tpu.dot_dimension_numbers<[1], [0], [0], [1], [0, 0, 1, 1], [], []>} : vector<8x128xf32>, vector<128x512xf32>, vector<8x512xf32> -> vector<8x512xf32>
    %c0_3 = arith.constant 0 : index
    %c0_4 = arith.constant 0 : index
    %3 = vector.load %arg3[%c0_3, %c0_4] : memref<1x512xf32, #tpu.memory_space<vmem>>, vector<1x512xf32>
    %4 = vector.broadcast %3 : vector<1x512xf32> to vector<8x512xf32>
    %5 = arith.addf %2, %4 : vector<8x512xf32>
    %cst_5 = arith.constant 5.000000e-01 : f32
    %6 = vector.broadcast %cst_5 : f32 to vector<8x512xf32>
    %7 = arith.mulf %6, %5 : vector<8x512xf32>
    %cst_6 = arith.constant 0.707106769 : f32
    %8 = vector.broadcast %cst_6 : f32 to vector<8x512xf32>
    %9 = arith.mulf %5, %8 : vector<8x512xf32>
    %10 = math.erf %9 : vector<8x512xf32>
    %cst_7 = arith.constant 1.000000e+00 : f32
    %11 = vector.broadcast %cst_7 : f32 to vector<8x512xf32>
    %12 = arith.addf %11, %10 : vector<8x512xf32>
    %13 = arith.mulf %7, %12 : vector<8x512xf32>
    %c0_8 = arith.constant 0 : index
    %c0_9 = arith.constant 0 : index
    %14 = vector.load %arg4[%c0_8, %c0_9] : memref<512x128xf32, #tpu.memory_space<vmem>>, vector<512x128xf32>
    %cst_10 = arith.constant dense<0.000000e+00> : vector<8x128xf32>
    %15 = tpu.matmul %13, %14, %cst_10 {dimension_numbers = #tpu.dot_dimension_numbers<[1], [0], [0], [1], [0, 0, 1, 1], [], []>} : vector<8x512xf32>, vector<512x128xf32>, vector<8x128xf32> -> vector<8x128xf32>
    %c0_11 = arith.constant 0 : index
    %c0_12 = arith.constant 0 : index
    %16 = vector.load %arg5[%c0_11, %c0_12] : memref<1x128xf32, #tpu.memory_space<vmem>>, vector<1x128xf32>
    %17 = vector.broadcast %16 : vector<1x128xf32> to vector<8x128xf32>
    %18 = arith.addf %15, %17 : vector<8x128xf32>
    %c0_13 = arith.constant 0 : index
    %c0_14 = arith.constant 0 : index
    %19 = vector.load %arg6[%c0_13, %c0_14] : memref<8x128xf32, #tpu.memory_space<vmem>>, vector<8x128xf32>
    tpu.vector_store %arg6[%c0_13, %c0_14], %18 {strides = array<i32>} : memref<8x128xf32, #tpu.memory_space<vmem>>, vector<8x128xf32>,
    return
  }
  func.func @transform_0(%arg0: i32) -> (i32, i32) {
    %c0_i32 = arith.constant 0 : i32
    %c0_i32_0 = arith.constant 0 : i32
    return %arg0, %c0_i32 : i32, i32
  }
  func.func @transform_1(%arg0: i32) -> (i32, i32) {
    %c0_i32 = arith.constant 0 : i32
    %c0_i32_0 = arith.constant 0 : i32
    %c0_i32_1 = arith.constant 0 : i32
    return %c0_i32, %c0_i32_0 : i32, i32
  }
  func.func @transform_2(%arg0: i32) -> (i32, i32) {
    %c0_i32 = arith.constant 0 : i32
    %c0_i32_0 = arith.constant 0 : i32
    %c0_i32_1 = arith.constant 0 : i32
    return %c0_i32, %c0_i32_0 : i32, i32
  }
  func.func @transform_3(%arg0: i32) -> (i32, i32) {
    %c0_i32 = arith.constant 0 : i32
    %c0_i32_0 = arith.constant 0 : i32
    %c0_i32_1 = arith.constant 0 : i32
    return %c0_i32, %c0_i32_0 : i32, i32
  }
  func.func @transform_4(%arg0: i32) -> (i32, i32) {
    %c0_i32 = arith.constant 0 : i32
    %c0_i32_0 = arith.constant 0 : i32
    %c0_i32_1 = arith.constant 0 : i32
    return %c0_i32, %c0_i32_0 : i32, i32
  }
  func.func @transform_5(%arg0: i32) -> (i32, i32) {
    %c0_i32 = arith.constant 0 : i32
    %c0_i32_0 = arith.constant 0 : i32
    return %arg0, %c0_i32 : i32, i32
  }
}

</mosaic_0001>

<bundles_post_ra>
// kernel: tpu_custom_call.1
= control target key start
LH: loop header
LB: loop body
LE: loop exit
PB: predicated region body
PF: predicated region fallthrough
CT: control target
= control target key end

     0   :  { %10 = vsyncpa [#allocation3], 0  ;;  %s1567_s0 = inlined_call_operand.hbm [shape: f32[16,128], index: 0, kind: input, shape index: {}]   ;;  %s1568_s1 = inlined_call_operand.hbm [shape: f32[128,512], index: 1, kind: input, shape index: {}]   ;;  %s1569_s2 = inlined_call_operand.vmem [shape: f32[1,512], index: 2, kind: input, shape index: {}]   ;;  %s1570_s3 = inlined_call_operand.hbm [shape: f32[512,128], index: 3, kind: input, shape index: {}]   ;;  %s1571_s4 = inlined_call_operand.vmem [shape: f32[1,128], index: 4, kind: input, shape index: {}]   ;;  %s1572_s5 = inlined_call_operand.hbm [shape: f32[16,128], index: 5, kind: output, shape index: {}]  }
   0x1   :  { %12 = vsyncpa [#allocation3 + $0x1], 0 }
   0x2   :  { %13 = vsyncpa [#allocation6], 0 }
   0x3   :  { %14 = vsyncpa [#allocation4], 0 }
   0x4   :  { %16 = vsyncpa [#allocation4 + $0x1], 0  ;;  %s1325_s18 = smov 0   ;;  %s1327_s19 = smov 0  }
   0x5   :  { %s1329_s20 = smov 0   ;;  %s1331_s21 = smov 0  }
   0x6 LB: > { %s1346_s22 = sadd.s32 4294967295, %s1284_s21   ;;  %s833_s23 = sadd.s32 4294967294, %s1284_s21   ;;  %s1284_s21 = sphi %s1331_s21, %s1592_s21   ;;  %s1280_s20 = sphi %s1329_s20, %s1591_s20   ;;  %s1276_s19 = sphi %s1327_s19, %s1590_s19   ;;  %s1272_s18 = sphi %s1325_s18, %s1589_s18  }
   0x7   : > { %p42_p0 = scmp.ne.s32.totalorder %s1276_s19, %s1272_s18  ;;  %p1573_p1 = scmp.eq.s32.totalorder %s1346_s22, 0 }
   0x8   : > { %p156_p3 = scmp.eq.s32.totalorder %s833_s23, 1  ;;  %p834_p5 = scmp.ge.s32.totalorder %s1284_s21, 1 }
   0x9   : > { %p1355_p4 = por %p1573_p1, %p42_p0  ;;  %p163_p7 = scmp.lt.s32.totalorder %s1284_s21, 3 }
   0xa   : > { %p1360_p6 = por %p156_p3, %p42_p0  ;;  %s1286_s27 = smov [#allocation5]  }
   0xb   : > { %s1576_s24 = scalar_select %p1355_p4, 1, 0 }
   0xc   : > { %s1577_s25 = scalar_select %p1360_p6, 1, 0 }
   0xd   : > { %p1365_p8 = pnand %p834_p5, %p163_p7  ;;  %s175_s28 = sshll.u32 %s1286_s27, 4  ;;  %s1369_s28 = int_to_ptr.vmem [resolvable:$true] %s175_s28 }
   0xe   : > { %s1287_s30 = smov [#allocation7]   ;;  %s1128_s9 = scalar_lea.hbm %s1568_s1, 8192 }
   0xf   : > { %p1060_p9 = pneg %p1365_p8  ;;  %s191_s6 = sshll.u32 %s1287_s30, 4  ;;  %s1380_s6 = int_to_ptr.vmem [resolvable:$true] %s191_s6 }
  0x10   : > { %p1129_p12 = scmp.ne.s32.totalorder %s1568_s1, %s1128_s9  ;;  %p1135_p5 = scmp.lt.u32.totalorder %s1128_s9, %s1568_s1 }
  0x11   : > { %p1376_p11 = pnand %p1060_p9, %p1573_p1 }
  0x13   : > { %p1130_p13 = pneg %p1376_p11 }
  0x15   : > { %p1131_p0 = pnand %p1130_p13, %p1129_p12 }
  0x17   : > { %p1132_p3 = pneg %p1131_p0 }
  0x19   : > { %p1137_p7 = pnand %p1135_p5, %p1132_p3 }
  0x1b   : > { %1140 = shalt.err (!%p1137_p7)
}
  0x1c   : > { %s1141_s14 = scalar_lea.vmem %s1369_s28, 8192  ;;  %p1149_p2 = scmp.lt.s32.totalorder %s1369_s28, %s1369_s28 }
  0x1d   : > { %p1142_p9 = scmp.ne.s32.totalorder %s1369_s28, %s1141_s14  ;;  %p1150_p12 = scmp.lt.s32.totalorder %s1141_s14, %s1141_s14 }
  0x1f   : > { %p1144_p10 = pnand %p1142_p9, %p1130_p13  ;;  %p1151_p0 = por %p1150_p12, %p1149_p2 }
  0x21   : > { %p1145_p1 = pneg %p1144_p10 }
  0x23   : > { %p1152_p6 = pnand %p1151_p0, %p1145_p1 }
  0x25   : > { %1155 = shalt.err (!%p1152_p6)
}
  0x26   : > { %s1288_s15 = smov 512   ;;  %s1289_s16 = smov 32  }
  0x27   : > { %1063 = dma.hbm_to_vmem [thread:$0]  (!%p1376_p11), %s1568_s1, 8192, %s1369_s28, [#allocation6], %s1288_s15, %s1288_s15, %s1289_s16  }
  0x28   : > { %s1156_s7 = scalar_lea.hbm %s1570_s3, 8192 }
  0x29   : > { %p1157_p2 = scmp.ne.s32.totalorder %s1570_s3, %s1156_s7  ;;  %p1163_p10 = scmp.lt.u32.totalorder %s1156_s7, %s1570_s3 }
  0x2b   : > { %p1159_p1 = pnand %p1157_p2, %p1130_p13 }
  0x2d   : > { %p1160_p6 = pneg %p1159_p1 }
  0x2f   : > { %p1165_p3 = pnand %p1163_p10, %p1160_p6 }
  0x31   : > { %1168 = shalt.err (!%p1165_p3)
}
  0x32   : > { %s1169_s28 = scalar_lea.vmem %s1380_s6, 8192  ;;  %p1177_p12 = scmp.lt.s32.totalorder %s1380_s6, %s1380_s6 }
  0x33   : > { %p1170_p5 = scmp.ne.s32.totalorder %s1380_s6, %s1169_s28  ;;  %p1178_p0 = scmp.lt.s32.totalorder %s1169_s28, %s1169_s28 }
  0x35   : > { %p1172_p7 = pnand %p1170_p5, %p1130_p13  ;;  %p1179_p2 = por %p1178_p0, %p1177_p12 }
  0x37   : > { %p1173_p9 = pneg %p1172_p7 }
  0x39   : > { %p1180_p1 = pnand %p1179_p2, %p1173_p9 }
  0x3b   : > { %1183 = shalt.err (!%p1180_p1)
}
  0x3c   : > { %s1290_s12 = smov 128   ;;  %s1291_s13 = smov 8  }
  0x3d   : > { %1066 = dma.hbm_to_vmem [thread:$0]  (!%p1376_p11), %s1570_s3, 8192, %s1380_s6, [#allocation6], %s1290_s12, %s1290_s12, %s1291_s13  }
  0x3e   : > { %s1435_s16 = sadd.s32 1, %s1284_s21   ;;  %s29_s23 = sadd.s32 1, %s1280_s20 }
  0x3f   : > { %s26_s17 = ssub.s32 %s1284_s21, %s1435_s16  ;;  %p36_p6 = scmp.ne.s32.totalorder %s1280_s20, %s1276_s19 }
  0x40   : > { %p27_p13 = scmp.eq.s32.totalorder %s26_s17, 0  ;;  %p37_p10 = scmp.eq.s32.totalorder %s1284_s21, 0 }
  0x41   : > { %p1580_p5 = scmp.eq.s32.totalorder %s1346_s22, 1  ;;  %p1077_p9 = scmp.lt.s32.totalorder %s1284_s21, 2 }
  0x42   : > { %s1444_s27 = scalar_select %p27_p13, %s1280_s20, %s29_s23  }
  0x43   : > { %p38_p3 = por %p37_p10, %p36_p6  ;;  %p1448_p7 = por %p1580_p5, %p36_p6 }
  0x44   : > { %s208_s29 = sand.u32 1, %s1280_s20   ;;  %s839_s6 = sshll.u32 %s1284_s21, 7 }
  0x45   : > { %s1581_s30 = scalar_select %p1448_p7, 1, 0 }
  0x46   : > { %s838_s7 = sshll.u32 %s208_s29, 3  ;;  %s1458_s10 = scalar_lea.hbm %s1567_s0, %s839_s6 }
  0x47   : > { %s212_s11 = scalar_lea.vmem [#allocation2], %s838_s7  ;;  %p1462_p11 = pnand %p1077_p9, %p38_p3 }
  0x48   : > { %s219_s28 = sshll.u32 %s212_s11, 4  ;;  %s209_s13 = scalar_lea.sflag [#allocation3], %s208_s29  ;;  %s1460_s28 = int_to_ptr.vmem [resolvable:$true] %s219_s28 }
  0x49   : > { %s1184_s14 = scalar_lea.hbm %s1458_s10, 128  ;;  %p1186_p0 = pneg %p1462_p11 }
  0x4a   : > { %p1185_p12 = scmp.ne.s32.totalorder %s1458_s10, %s1184_s14  ;;  %s1189_s23 = scalar_lea.hbm %s1567_s0, 256 }
  0x4b   : > { %p1190_p13 = scmp.lt.u32.totalorder %s1458_s10, %s1567_s0  ;;  %p1191_p6 = scmp.lt.u32.totalorder %s1189_s23, %s1184_s14 }
  0x4c   : > { %p1187_p2 = pnand %p1186_p0, %p1185_p12  ;;  %p1193_p3 = scmp.lt.u32.totalorder %s1184_s14, %s1458_s10 }
  0x4d   : > { %p1192_p10 = por %p1191_p6, %p1190_p13 }
  0x4e   : > { %p1188_p1 = pneg %p1187_p2 }
  0x4f   : > { %p1194_p5 = por %p1193_p3, %p1192_p10 }
  0x51   : > { %p1195_p9 = pnand %p1194_p5, %p1188_p1 }
  0x53   : > { %1198 = shalt.err (!%p1195_p9)
}
  0x54   : > { %s1199_s29 = scalar_lea.vmem %s1460_s28, 128  ;;  %s1292_s8 = smov [#allocation2]  }
  0x55   : > { %p1200_p12 = scmp.ne.s32.totalorder %s1460_s28, %s1199_s29  ;;  %s1204_s9 = sshll.u32 %s1292_s8, 4  ;;  %s1205_s9 = int_to_ptr.vmem [resolvable:$false] %s1204_s9 }
  0x56   : > { %s1206_s11 = scalar_lea.vmem %s1205_s9, 256  ;;  %p1207_p4 = scmp.lt.s32.totalorder %s1460_s28, %s1205_s9 }
  0x57   : > { %p1202_p2 = pnand %p1200_p12, %p1186_p0  ;;  %p1208_p13 = scmp.lt.s32.totalorder %s1206_s11, %s1199_s29 }
  0x59   : > { %p1203_p7 = pneg %p1202_p2  ;;  %p1209_p6 = por %p1208_p13, %p1207_p4 }
  0x5b   : > { %p1210_p10 = pnand %p1209_p6, %p1203_p7 }
  0x5d   : > { %1213 = shalt.err (!%p1210_p10)
}
  0x5e   : > { %1070 = dma.hbm_to_vmem [thread:$0]  (!%p1462_p11), %s1458_s10, 128, %s1460_s28, %s209_s13  }
  0x5f   : > { %228 = sbr.rel (%p1365_p8) target bundleno = 609 (0x261), region = 40  ;;  %s1494_s14 = sand.u32 (!%p1365_p8), 1, %s1276_s19  }
  0x60   : > { %s841_s15 = sshll.u32 (!%p1365_p8), %s1494_s14, 3  ;;  %s231_s17 = scalar_lea.sflag (!%p1365_p8), [#allocation3], %s1494_s14 }
  0x61   : > { %s1500_s23 = scalar_lea.vmem (!%p1365_p8), [#allocation2], %s841_s15  ;;  %p1583_p4 = scmp.ne.s32.totalorder (!%p1365_p8), %s1576_s24, 0 }
  0x66   : > { %1259 = dma.done.wait (%p1583_p4), %s231_s17, 128  }
  0x67   : > { %1261 = vsyncadd (%p1583_p4), %s231_s17, 4294967168  ;;  %p1584_p7 = scmp.eq.s32.totalorder %s1346_s22, 0 }
  0x69   : > { %1263 = dma.done.wait (%p1584_p7), [#allocation6], 16384   ;;  %p1585_p8 = pmov %p1584_p7 }
  0x6a   : > { %v1293_v0 = vmov 0.0   ;;  %v271_v1 = vld [vmem:[#allocation5 + $0x8] sm:$0xff]  ;;  %v273_v3 = vld [vmem:[#allocation5 + $0x18] sm:$0xff]  ;;  %v270_v6 = vld [vmem:[#allocation5] sm:$0xff]  ;;  %s847_s12 = sshll.u32 %s1346_s22, 7  ;;  %s268_s13 = scalar_lea.vmem [#allocation8], %s841_s15 }
  0x6b   : > { %1265 = vsyncadd (%p1585_p8), [#allocation6], 4294950912  ;;  %420 = vmatprep.mubr.f32.mxu0 %v1293_v0  ;;  %491 = vmatprep.mubr.f32.mxu1 %v1293_v0  ;;  %v275_v2 = vld [vmem:[#allocation5 + $0x28] sm:$0xff]  ;;  %v277_v5 = vld [vmem:[#allocation5 + $0x38] sm:$0xff]  ;;  %s744_s7 = sshll.u32 %s268_s13, 4  ;;  %s1523_s8 = scalar_lea.hbm %s1572_s5, %s847_s12  ;;  %s1525_s7 = int_to_ptr.vmem [resolvable:$true] %s744_s7 }
  0x6c   : > { %v920_v4 = vpack.c.bf16 %v275_v2, %v271_v1  ;;  %v274_v7 = vld [vmem:[#allocation5 + $0x20] sm:$0xff]  ;;  %v952_v8 = vpack.c.bf16 %v277_v5, %v273_v3  ;;  %v272_v10 = vld [vmem:[#allocation5 + $0x10] sm:$0xff]  ;;  %v279_v12 = vld [vmem:[#allocation5 + $0x48] sm:$0xff]  ;;  %s731_s9 = scalar_lea.sflag [#allocation4], %s1494_s14  ;;  %s1214_s11 = scalar_lea.vmem %s1525_s7, 128 }
  0x6d   : > { %v922_v9 = vpack.c.bf16 %v274_v7, %v270_v6  ;;  %v276_v11 = vld [vmem:[#allocation5 + $0x30] sm:$0xff]  ;;  %v283_v14 = vld [vmem:[#allocation5 + $0x68] sm:$0xff]  ;;  %v281_v15 = vld [vmem:[#allocation5 + $0x58] sm:$0xff]  ;;  %p1215_p11 = scmp.ne.s32.totalorder %s1525_s7, %s1214_s11  ;;  %p1586_p0 = scmp.ne.s32.totalorder %s1581_s30, 0 }
  0x6e   : > { %921 = vmatprep.subr.bf16.mxu0 %v920_v4  ;;  %v954_v13 = vpack.c.bf16 %v276_v11, %v272_v10  ;;  %v285_v16 = vld [vmem:[#allocation5 + $0x78] sm:$0xff]  ;;  %953 = vmatprep.subr.bf16.mxu1 %v952_v8  ;;  %v924_v17 = vpack.c.bf16 %v283_v14, %v279_v12  ;;  %v278_v19 = vld [vmem:[#allocation5 + $0x40] sm:$0xff]  ;;  %v280_v21 = vld [vmem:[#allocation5 + $0x50] sm:$0xff]  ;;  %s1294_s22 = smov [#allocation8]  }
  0x6f   : > { %923 = vmatpush1.bf16.msra.mxu0 %v922_v9  ;;  %v956_v18 = vpack.c.bf16 %v285_v16, %v281_v15  ;;  %v282_v20 = vld [vmem:[#allocation5 + $0x60] sm:$0xff]  ;;  %v284_v23 = vld [vmem:[#allocation5 + $0x70] sm:$0xff]  ;;  %v287_v24 = vld [vmem:[#allocation5 + $0x88] sm:$0xff]  ;;  %p1216_p1 = pnand %p1215_p11, %p1586_p0  ;;  %s1218_s15 = sshll.u32 %s1294_s22, 4  ;;  %s1219_s15 = int_to_ptr.vmem [resolvable:$false] %s1218_s15 }
  0x70   : > { %955 = vmatpush1.bf16.msra.mxu1 %v954_v13  ;;  %v926_v22 = vpack.c.bf16 %v282_v20, %v278_v19  ;;  %v291_v25 = vld [vmem:[#allocation5 + $0xa8] sm:$0xff]  ;;  %925 = vmatprep.subr.bf16.mxu0 %v924_v17  ;;  %v958_v26 = vpack.c.bf16 %v284_v23, %v280_v21  ;;  %v289_v28 = vld [vmem:[#allocation5 + $0x98] sm:$0xff]  ;;  %v286_v30 = vld [vmem:[#allocation5 + $0x80] sm:$0xff]  ;;  %s1220_s17 = scalar_lea.vmem %s1219_s15, 256  ;;  %p1221_p5 = scmp.lt.s32.totalorder %s1525_s7, %s1219_s15 }
  0x71   : > { %957 = vmatprep.subr.bf16.mxu1 %v956_v18  ;;  %v928_v27 = vpack.c.bf16 %v291_v25, %v287_v24  ;;  %v293_v29 = vld [vmem:[#allocation5 + $0xb8] sm:$0xff]  ;;  %v290_v32 = vld [vmem:[#allocation5 + $0xa0] sm:$0xff]  ;;  %v288_v33 = vld [vmem:[#allocation5 + $0x90] sm:$0xff]  ;;  %p1217_p3 = pneg %p1216_p1  ;;  %p1222_p9 = scmp.lt.s32.totalorder %s1220_s17, %s1214_s11 }
  0x72   : > { %v960_v31 = vpack.c.bf16 %v293_v29, %v289_v28  ;;  %v292_v34 = vld [vmem:[#allocation5 + $0xb0] sm:$0xff]  ;;  %v930_v35 = vpack.c.bf16 %v290_v32, %v286_v30  ;;  %v295_v36 = vld [vmem:[#allocation5 + $0xc8] sm:$0xff]  ;;  %v297_v38 = vld [vmem:[#allocation5 + $0xd8] sm:$0xff] }
  0x73   : > { %927 = vmatpush1.bf16.msra.mxu0 %v926_v22  ;;  %v299_v37 = vld [vmem:[#allocation5 + $0xe8] sm:$0xff]  ;;  %v962_v39 = vpack.c.bf16 %v292_v34, %v288_v33  ;;  %v301_v41 = vld [vmem:[#allocation5 + $0xf8] sm:$0xff]  ;;  %v294_v42 = vld [vmem:[#allocation5 + $0xc0] sm:$0xff]  ;;  %p1223_p12 = por %p1222_p9, %p1221_p5 }
  0x74   : > { %959 = vmatpush1.bf16.msra.mxu1 %v958_v26  ;;  %929 = vmatprep.subr.bf16.mxu0 %v928_v27  ;;  %v932_v40 = vpack.c.bf16 %v299_v37, %v295_v36  ;;  %v298_v43 = vld [vmem:[#allocation5 + $0xe0] sm:$0xff]  ;;  %v964_v44 = vpack.c.bf16 %v301_v41, %v297_v38  ;;  %v296_v45 = vld [vmem:[#allocation5 + $0xd0] sm:$0xff]  ;;  %v303_v47 = vld [vmem:[#allocation5 + $0x108] sm:$0xff] }
  0x75   : > { %961 = vmatprep.subr.bf16.mxu1 %v960_v31  ;;  %v300_v46 = vld [vmem:[#allocation5 + $0xf0] sm:$0xff]  ;;  %v307_v48 = vld [vmem:[#allocation5 + $0x128] sm:$0xff]  ;;  %v305_v49 = vld [vmem:[#allocation5 + $0x118] sm:$0xff]  ;;  %v934_v51 = vpack.c.bf16 %v298_v43, %v294_v42  ;;  %p1224_p2 = pnand %p1223_p12, %p1217_p3 }
  0x76   : > { %v309_v50 = vld [vmem:[#allocation5 + $0x138] sm:$0xff]  ;;  %v966_v52 = vpack.c.bf16 %v300_v46, %v296_v45  ;;  %v936_v53 = vpack.c.bf16 %v307_v48, %v303_v47  ;;  %v302_v54 = vld [vmem:[#allocation5 + $0x100] sm:$0xff]  ;;  %v304_v56 = vld [vmem:[#allocation5 + $0x110] sm:$0xff] }
  0x77   : > { %931 = vmatpush1.bf16.msra.mxu0 %v930_v35  ;;  %v306_v55 = vld [vmem:[#allocation5 + $0x120] sm:$0xff]  ;;  %v968_v57 = vpack.c.bf16 %v309_v50, %v305_v49  ;;  %v308_v58 = vld [vmem:[#allocation5 + $0x130] sm:$0xff]  ;;  %v311_v59 = vld [vmem:[#allocation5 + $0x148] sm:$0xff] }
  0x78   : > { %963 = vmatpush1.bf16.msra.mxu1 %v962_v39  ;;  %933 = vmatprep.subr.bf16.mxu0 %v932_v40  ;;  %v315_v60 = vld [vmem:[#allocation5 + $0x168] sm:$0xff]  ;;  %v313_v61 = vld [vmem:[#allocation5 + $0x158] sm:$0xff]  ;;  %v938_v63 = vpack.c.bf16 %v306_v55, %v302_v54  ;;  %v970_v0 = vpack.c.bf16 %v308_v58, %v304_v56  ;;  %v310_v2 = vld [vmem:[#allocation5 + $0x140] sm:$0xff] }
  0x79   : > { %965 = vmatprep.subr.bf16.mxu1 %v964_v44  ;;  %v317_v62 = vld [vmem:[#allocation5 + $0x178] sm:$0xff]  ;;  %v940_v1 = vpack.c.bf16 %v315_v60, %v311_v59  ;;  %v314_v3 = vld [vmem:[#allocation5 + $0x160] sm:$0xff]  ;;  %v312_v4 = vld [vmem:[#allocation5 + $0x150] sm:$0xff] }
  0x7a   : > { %v972_v5 = vpack.c.bf16 %v317_v62, %v313_v61  ;;  %v316_v6 = vld [vmem:[#allocation5 + $0x170] sm:$0xff]  ;;  %v319_v7 = vld [vmem:[#allocation5 + $0x188] sm:$0xff]  ;;  %v321_v9 = vld [vmem:[#allocation5 + $0x198] sm:$0xff]  ;;  %v942_v11 = vpack.c.bf16 %v314_v3, %v310_v2 }
  0x7b   : > { %935 = vmatpush1.bf16.msra.mxu0 %v934_v51  ;;  %v323_v8 = vld [vmem:[#allocation5 + $0x1a8] sm:$0xff]  ;;  %v325_v10 = vld [vmem:[#allocation5 + $0x1b8] sm:$0xff]  ;;  %v974_v12 = vpack.c.bf16 %v316_v6, %v312_v4  ;;  %v318_v14 = vld [vmem:[#allocation5 + $0x180] sm:$0xff] }
  0x7c   : > { %967 = vmatpush1.bf16.msra.mxu1 %v966_v52  ;;  %937 = vmatprep.subr.bf16.mxu0 %v936_v53  ;;  %v944_v13 = vpack.c.bf16 %v323_v8, %v319_v7  ;;  %v322_v15 = vld [vmem:[#allocation5 + $0x1a0] sm:$0xff]  ;;  %v320_v16 = vld [vmem:[#allocation5 + $0x190] sm:$0xff]  ;;  %v976_v17 = vpack.c.bf16 %v325_v10, %v321_v9  ;;  %v327_v19 = vld [vmem:[#allocation5 + $0x1c8] sm:$0xff] }
  0x7d   : > { %969 = vmatprep.subr.bf16.mxu1 %v968_v57  ;;  %v324_v18 = vld [vmem:[#allocation5 + $0x1b0] sm:$0xff]  ;;  %v331_v20 = vld [vmem:[#allocation5 + $0x1e8] sm:$0xff]  ;;  %v329_v21 = vld [vmem:[#allocation5 + $0x1d8] sm:$0xff]  ;;  %v946_v23 = vpack.c.bf16 %v322_v15, %v318_v14 }
  0x7e   : > { %v333_v22 = vld [vmem:[#allocation5 + $0x1f8] sm:$0xff]  ;;  %v978_v24 = vpack.c.bf16 %v324_v18, %v320_v16  ;;  %v948_v25 = vpack.c.bf16 %v331_v20, %v327_v19  ;;  %v326_v26 = vld [vmem:[#allocation5 + $0x1c0] sm:$0xff]  ;;  %v328_v28 = vld [vmem:[#allocation5 + $0x1d0] sm:$0xff] }
  0x7f   : > { %939 = vmatpush1.bf16.msra.mxu0 %v938_v63  ;;  %v330_v27 = vld [vmem:[#allocation5 + $0x1e0] sm:$0xff]  ;;  %v980_v29 = vpack.c.bf16 %v333_v22, %v329_v21  ;;  %v332_v30 = vld [vmem:[#allocation5 + $0x1f0] sm:$0xff]  ;;  %v535_v32 = vld [vmem:[#allocation7 + $0x88] sm:$0xff] }
  0x80   : > { %971 = vmatpush1.bf16.msra.mxu1 %v970_v0  ;;  %941 = vmatprep.subr.bf16.mxu0 %v940_v1  ;;  %v534_v31 = vld [vmem:[#allocation7 + $0x80] sm:$0xff]  ;;  %v567_v34 = vld [vmem:[#allocation7 + $0x188] sm:$0xff]  ;;  %v950_v35 = vpack.c.bf16 %v330_v27, %v326_v26  ;;  %v982_v36 = vpack.c.bf16 %v332_v30, %v328_v28  ;;  %v536_v43 = vld [vmem:[#allocation7 + $0x90] sm:$0xff] }
  0x81   : > { %973 = vmatprep.subr.bf16.mxu1 %v972_v5  ;;  %v566_v33 = vld [vmem:[#allocation7 + $0x180] sm:$0xff]  ;;  %v984_v37 = vpack.c.bf16 %v535_v32, %v534_v31  ;;  %v519_v39 = vld [vmem:[#allocation7 + $0x8] sm:$0xff]  ;;  %v537_v44 = vld [vmem:[#allocation7 + $0x98] sm:$0xff] }
  0x82   : > { %v518_v38 = vld [vmem:[#allocation7] sm:$0xff]  ;;  %v1016_v41 = vpack.c.bf16 %v567_v34, %v566_v33  ;;  %v551_v42 = vld [vmem:[#allocation7 + $0x108] sm:$0xff]  ;;  %v568_v45 = vld [vmem:[#allocation7 + $0x190] sm:$0xff]  ;;  %v988_v50 = vpack.c.bf16 %v537_v44, %v536_v43 }
  0x83   : > { %943 = vmatpush1.bf16.msra.mxu0 %v942_v11  ;;  %v550_v40 = vld [vmem:[#allocation7 + $0x100] sm:$0xff]  ;;  %v569_v46 = vld [vmem:[#allocation7 + $0x198] sm:$0xff]  ;;  %v986_v48 = vpack.c.bf16 %v519_v39, %v518_v38  ;;  %v520_v51 = vld [vmem:[#allocation7 + $0x10] sm:$0xff] }
  0x84   : > { %975 = vmatpush1.bf16.msra.mxu1 %v974_v12  ;;  %945 = vmatprep.subr.bf16.mxu0 %v944_v13  ;;  %v269_v47 = vld [vmem:[%s1500_s23] sm:$0xff]  ;;  %v1018_v49 = vpack.c.bf16 %v551_v42, %v550_v40  ;;  %v1020_v54 = vpack.c.bf16 %v569_v46, %v568_v45  ;;  %v538_v56 = vld [vmem:[#allocation7 + $0xa0] sm:$0xff]  ;;  %v539_v57 = vld [vmem:[#allocation7 + $0xa8] sm:$0xff] }
  0x85   : > { %977 = vmatprep.subr.bf16.mxu1 %v976_v17  ;;  %v521_v52 = vld [vmem:[#allocation7 + $0x18] sm:$0xff]  ;;  %v552_v53 = vld [vmem:[#allocation7 + $0x110] sm:$0xff]  ;;  %v570_v58 = vld [vmem:[#allocation7 + $0x1a0] sm:$0xff]  ;;  %v992_v62 = vpack.c.bf16 %v539_v57, %v538_v56 }
  0x86   : > { %v553_v55 = vld [vmem:[#allocation7 + $0x118] sm:$0xff]  ;;  %v571_v59 = vld [vmem:[#allocation7 + $0x1a8] sm:$0xff]  ;;  %v990_v60 = vpack.c.bf16 %v521_v52, %v520_v51  ;;  %v522_v63 = vld [vmem:[#allocation7 + $0x20] sm:$0xff] }
  0x87   : > { %947 = vmatpush1.bf16.msra.mxu0 %v946_v23  ;;  %v1022_v61 = vpack.c.bf16 %v553_v55, %v552_v53  ;;  %v523_v0 = vld [vmem:[#allocation7 + $0x28] sm:$0xff]  ;;  %v1024_v1 = vpack.c.bf16 %v571_v59, %v570_v58  ;;  %v554_v2 = vld [vmem:[#allocation7 + $0x120] sm:$0xff]  ;;  %v540_v6 = vld [vmem:[#allocation7 + $0xb0] sm:$0xff] }
  0x88   : > { %979 = vmatpush1.bf16.msra.mxu1 %v978_v24  ;;  %949 = vmatprep.subr.bf16.mxu0 %v948_v25  ;;  %v555_v3 = vld [vmem:[#allocation7 + $0x128] sm:$0xff]  ;;  %v994_v4 = vpack.c.bf16 %v523_v0, %v522_v63  ;;  %v541_v7 = vld [vmem:[#allocation7 + $0xb8] sm:$0xff]  ;;  %v572_v8 = vld [vmem:[#allocation7 + $0x1b0] sm:$0xff] }
  0x89   : > { %981 = vmatprep.subr.bf16.mxu1 %v980_v29  ;;  %v1026_v5 = vpack.c.bf16 %v555_v3, %v554_v2  ;;  %v996_v9 = vpack.c.bf16 %v541_v7, %v540_v6  ;;  %v573_v10 = vld [vmem:[#allocation7 + $0x1b8] sm:$0xff]  ;;  %v524_v11 = vld [vmem:[#allocation7 + $0x30] sm:$0xff]  ;;  %v542_v18 = vld [vmem:[#allocation7 + $0xc0] sm:$0xff]  ;;  %v336_v2 = vlaneseq }
  0x8a   : > { %v525_v12 = vld [vmem:[#allocation7 + $0x38] sm:$0xff]  ;;  %v1028_v13 = vpack.c.bf16 %v573_v10, %v572_v8  ;;  %v556_v15 = vld [vmem:[#allocation7 + $0x130] sm:$0xff]  ;;  %v543_v19 = vld [vmem:[#allocation7 + $0xc8] sm:$0xff] }
  0x8b   : > { %951 = vmatpush1.bf16.msra.mxu0 %v950_v35  ;;  %v998_v14 = vpack.c.bf16 %v525_v12, %v524_v11  ;;  %v557_v16 = vld [vmem:[#allocation7 + $0x138] sm:$0xff]  ;;  %v574_v20 = vld [vmem:[#allocation7 + $0x1c0] sm:$0xff]  ;;  %v1000_v21 = vpack.c.bf16 %v543_v19, %v542_v18  ;;  %v575_v22 = vld [vmem:[#allocation7 + $0x1c8] sm:$0xff]  ;;  %v337_v3 = vshrl.u32 %v336_v2, 7 }
  0x8c   : > { %983 = vmatpush1.bf16.msra.mxu1 %v982_v36  ;;  %985 = vmatprep.subr.bf16.mxu0 %v984_v37  ;;  %v1030_v17 = vpack.c.bf16 %v557_v16, %v556_v15  ;;  %v526_v23 = vld [vmem:[#allocation7 + $0x40] sm:$0xff]  ;;  %v527_v24 = vld [vmem:[#allocation7 + $0x48] sm:$0xff]  ;;  %v1032_v25 = vpack.c.bf16 %v575_v22, %v574_v20  ;;  %v544_v30 = vld [vmem:[#allocation7 + $0xd0] sm:$0xff] }
  0x8d   : > { %1017 = vmatprep.subr.bf16.mxu1 %v1016_v41  ;;  %v1002_v26 = vpack.c.bf16 %v527_v24, %v526_v23  ;;  %v558_v27 = vld [vmem:[#allocation7 + $0x140] sm:$0xff]  ;;  %v559_v28 = vld [vmem:[#allocation7 + $0x148] sm:$0xff]  ;;  %v545_v31 = vld [vmem:[#allocation7 + $0xd8] sm:$0xff]  ;;  %v346_v6 = vsub.s32 2, %v337_v3  ;;  %v342_v7 = vsub.s32 1, %v337_v3  ;;  %v350_v8 = vsub.s32 3, %v337_v3 }
  0x8e   : > { %421 = vmatmul.mubr.f32.vlgmr.msra.gmra.mrb[0].mxu0 %v269_v47  ;;  %v1034_v29 = vpack.c.bf16 %v559_v28, %v558_v27  ;;  %v576_v32 = vld [vmem:[#allocation7 + $0x1d0] sm:$0xff]  ;;  %v1004_v33 = vpack.c.bf16 %v545_v31, %v544_v30  ;;  %v577_v34 = vld [vmem:[#allocation7 + $0x1d8] sm:$0xff]  ;;  %v546_v42 = vld [vmem:[#allocation7 + $0xe0] sm:$0xff] }
  0x8f   : > { %492 = vmatmul.mubr.f32.vlgmr.msra.gmra.mrb[0].mxu1 %v269_v47  ;;  %987 = vmatpush3.bf16.msra.mxu0 %v986_v48  ;;  %v528_v35 = vld [vmem:[#allocation7 + $0x50] sm:$0xff]  ;;  %v529_v36 = vld [vmem:[#allocation7 + $0x58] sm:$0xff]  ;;  %v1036_v37 = vpack.c.bf16 %v577_v34, %v576_v32  ;;  %v547_v43 = vld [vmem:[#allocation7 + $0xe8] sm:$0xff] }
  0x90   : > { %1019 = vmatpush3.bf16.msra.mxu1 %v1018_v49  ;;  %989 = vmatprep.subr.bf16.mxu0 %v988_v50  ;;  %v1006_v38 = vpack.c.bf16 %v529_v36, %v528_v35  ;;  %v560_v39 = vld [vmem:[#allocation7 + $0x150] sm:$0xff]  ;;  %v561_v40 = vld [vmem:[#allocation7 + $0x158] sm:$0xff]  ;;  %v578_v44 = vld [vmem:[#allocation7 + $0x1e0] sm:$0xff]  ;;  %v1008_v45 = vpack.c.bf16 %v547_v43, %v546_v42 }
  0x91   : > { %1021 = vmatprep.subr.bf16.mxu1 %v1020_v54  ;;  %v1038_v41 = vpack.c.bf16 %v561_v40, %v560_v39  ;;  %v579_v46 = vld [vmem:[#allocation7 + $0x1e8] sm:$0xff]  ;;  %v530_v47 = vld [vmem:[#allocation7 + $0x60] sm:$0xff]  ;;  %v548_v54 = vld [vmem:[#allocation7 + $0xf0] sm:$0xff] }
  0x92   : > { %v531_v48 = vld [vmem:[#allocation7 + $0x68] sm:$0xff]  ;;  %v1040_v49 = vpack.c.bf16 %v579_v46, %v578_v44  ;;  %v562_v51 = vld [vmem:[#allocation7 + $0x160] sm:$0xff]  ;;  %v549_v55 = vld [vmem:[#allocation7 + $0xf8] sm:$0xff] }
  0x93   : > { %991 = vmatpush3.bf16.msra.mxu0 %v990_v60  ;;  %v1010_v50 = vpack.c.bf16 %v531_v48, %v530_v47  ;;  %v563_v52 = vld [vmem:[#allocation7 + $0x168] sm:$0xff]  ;;  %v580_v56 = vld [vmem:[#allocation7 + $0x1f0] sm:$0xff]  ;;  %v1012_v57 = vpack.c.bf16 %v549_v55, %v548_v54  ;;  %v581_v58 = vld [vmem:[#allocation7 + $0x1f8] sm:$0xff] }
  0x94   : > { %1023 = vmatpush3.bf16.msra.mxu1 %v1022_v61  ;;  %993 = vmatprep.subr.bf16.mxu0 %v992_v62  ;;  %v1042_v53 = vpack.c.bf16 %v563_v52, %v562_v51  ;;  %v532_v59 = vld [vmem:[#allocation7 + $0x70] sm:$0xff]  ;;  %v533_v60 = vld [vmem:[#allocation7 + $0x78] sm:$0xff]  ;;  %v1044_v61 = vpack.c.bf16 %v581_v58, %v580_v56 }
  0x95   : > { %1025 = vmatprep.subr.bf16.mxu1 %v1024_v1  ;;  %v1014_v62 = vpack.c.bf16 %v533_v60, %v532_v59  ;;  %v564_v63 = vld [vmem:[#allocation7 + $0x170] sm:$0xff]  ;;  %v565_v0 = vld [vmem:[#allocation7 + $0x178] sm:$0xff] }
  0x96   : > { %v1046_v1 = vpack.c.bf16 %v565_v0, %v564_v63  ;;  %v845_v43 = vld [vmem:[%s1571_s4] ss:$0 sm:$0xff] }
  0x97   : > { %995 = vmatpush3.bf16.msra.mxu0 %v994_v4  ;;  %v338_v4 = vsub.s32 0, %v337_v3 }
  0x98   : > { %1027 = vmatpush3.bf16.msra.mxu1 %v1026_v5  ;;  %997 = vmatprep.subr.bf16.mxu0 %v996_v9  ;;  %v334_v5 = vld [vmem:[%s1569_s2] sm:$0xf] }
  0x99   : > { %1029 = vmatprep.subr.bf16.mxu1 %v1028_v13  ;;  %v339_v9 = vrot.slane %v334_v5, %v338_v4  ;;  %v347_v10 = vrot.slane %v334_v5, %v346_v6  ;;  %v343_v11 = vrot.slane %v334_v5, %v342_v7  ;;  %v351_v12 = vrot.slane %v334_v5, %v350_v8 }
  0x9b   : > { %999 = vmatpush3.bf16.msra.mxu0 %v998_v14 }
  0x9c   : > { %1031 = vmatpush3.bf16.msra.mxu1 %v1030_v17  ;;  %1001 = vmatprep.subr.bf16.mxu0 %v1000_v21 }
  0x9d   : > { %1033 = vmatprep.subr.bf16.mxu1 %v1032_v25 }
  0x9f   : > { %1003 = vmatpush3.bf16.msra.mxu0 %v1002_v26 }
  0xa0   : > { %1035 = vmatpush3.bf16.msra.mxu1 %v1034_v29  ;;  %1005 = vmatprep.subr.bf16.mxu0 %v1004_v33 }
  0xa1   : > { %1037 = vmatprep.subr.bf16.mxu1 %v1036_v37 }
  0xa3   : > { %1007 = vmatpush3.bf16.msra.mxu0 %v1006_v38 }
  0xa4   : > { %1039 = vmatpush3.bf16.msra.mxu1 %v1038_v41  ;;  %1009 = vmatprep.subr.bf16.mxu0 %v1008_v45 }
  0xa5   : > { %1041 = vmatprep.subr.bf16.mxu1 %v1040_v49 }
  0xa7   : > { %1011 = vmatpush3.bf16.msra.mxu0 %v1010_v50 }
  0xa8   : > { %1043 = vmatpush3.bf16.msra.mxu1 %v1042_v53  ;;  %1013 = vmatprep.subr.bf16.mxu0 %v1012_v57 }
  0xa9   : > { %1045 = vmatprep.subr.bf16.mxu1 %v1044_v61 }
  0xab   : > { %1015 = vmatpush3.bf16.msra.mxu0 %v1014_v62 }
  0xac   : > { %1047 = vmatpush3.bf16.msra.mxu1 %v1046_v1 }
 0x161   : > { %v422_v13 = vpop.f32.mrb[0].mxu0 }
 0x162   : > { %v423_v14 = vadd.f32 %v422_v13, %v339_v9  ;;  %v493_v15 = vpop.f32.mrb[0].mxu1  ;;  %v424_v16 = vpop.f32.mrb[1].mxu0 }
 0x163   : > { %v494_v17 = vadd.f32 %v493_v15, %v347_v10  ;;  %v425_v18 = vadd.f32 %v424_v16, %v343_v11  ;;  %v495_v19 = vpop.f32.mrb[1].mxu1 }
 0x164   : > { %v502_v20 = vmul.f32 0.70710677, %v423_v14  ;;  %v496_v21 = vadd.f32 %v495_v19, %v351_v12  ;;  %v498_v33 = vmul.f32 0.5, %v423_v14 }
 0x165   : > { %v504_v22 = vmul.f32 0.70710677, %v494_v17  ;;  %v503_v23 = vmul.f32 0.70710677, %v425_v18  ;;  %v499_v31 = vmul.f32 0.5, %v425_v18  ;;  %v500_v36 = vmul.f32 0.5, %v494_v17 }
 0x166   : > { %1120 = verf.f32 %v502_v20  ;;  %v505_v24 = vmul.f32 0.70710677, %v496_v21  ;;  %v501_v34 = vmul.f32 0.5, %v496_v21 }
 0x167   : > { %1122 = verf.f32 %v504_v22 }
 0x168   : > { %1124 = verf.f32 %v503_v23 }
 0x169   : > { %1126 = verf.f32 %v505_v24 }
 0x170   : > { %v1121_v25 = vpop.eup %1120 }
 0x171   : > { %v1123_v26 = vpop.eup %1122  ;;  %v510_v28 = vadd.f32 1.0, %v1121_v25 }
 0x172   : > { %v1125_v27 = vpop.eup %1124  ;;  %v512_v30 = vadd.f32 1.0, %v1123_v26 }
 0x173   : > { %v1127_v29 = vpop.eup %1126  ;;  %v511_v32 = vadd.f32 1.0, %v1125_v27  ;;  %v514_v38 = vmul.f32 %v510_v28, %v498_v33 }
 0x174   : > { %v513_v35 = vadd.f32 1.0, %v1127_v29  ;;  %v516_v40 = vmul.f32 %v512_v30, %v500_v36 }
 0x175   : > { %v515_v37 = vmul.f32 %v511_v32, %v499_v31 }
 0x176   : > { %v517_v39 = vmul.f32 %v513_v35, %v501_v34 }
 0x177   : > { %653 = vmatprep.mubr.f32.mxu0 %v515_v37 }
 0x178   : > { %723 = vmatprep.mubr.f32.mxu1 %v517_v39  ;;  %654 = vmatmul.mubr.f32.vlgmr.msra.gmra.mrb[2].mxu0 %v514_v38 }
 0x179   : > { %724 = vmatmul.mubr.f32.vlgmr.msra.gmra.mrb[2].mxu1 %v516_v40 }
 0x24b   : > { %v882_v41 = vpop.f32.mrb[2].mxu0 }
 0x24c   : > { %v917_v42 = vpop.f32.mrb[2].mxu1  ;;  %v883_v44 = vpop.f32.mrb[3].mxu0 }
 0x24d   : > { %v884_v45 = vadd.f32 %v883_v44, %v882_v41  ;;  %v918_v46 = vpop.f32.mrb[3].mxu1 }
 0x24e   : > { %v919_v47 = vadd.f32 %v918_v46, %v917_v42 }
 0x24f   : > { %v656_v48 = vadd.f32 %v884_v45, %v845_v43 }
 0x251   : > { %v726_v49 = vadd.f32 %v919_v47, %v656_v48 }
 0x253   : > { %729 = vst [vmem:[%s268_s13] sm:$0xff] %v726_v49 }
 0x254   : > { %1227 = shalt.err (!%p1224_p2)
}
 0x255   : > { %s1228_s14 = scalar_lea.hbm %s1523_s8, 128  ;;  %s1232_s26 = scalar_lea.hbm %s1572_s5, 256 }
 0x256   : > { %p1229_p13 = scmp.ne.s32.totalorder %s1523_s8, %s1228_s14  ;;  %p1233_p4 = scmp.lt.u32.totalorder %s1523_s8, %s1572_s5 }
 0x257   : > { %p1234_p7 = scmp.lt.u32.totalorder %s1232_s26, %s1228_s14  ;;  %p1236_p11 = scmp.lt.u32.totalorder %s1228_s14, %s1523_s8 }
 0x258   : > { %p1230_p6 = pnand %p1229_p13, %p1586_p0 }
 0x259   : > { %p1235_p8 = por %p1234_p7, %p1233_p4 }
 0x25a   : > { %p1231_p10 = pneg %p1230_p6 }
 0x25b   : > { %p1237_p1 = por %p1236_p11, %p1235_p8 }
 0x25d   : > { %p1238_p3 = pnand %p1237_p1, %p1231_p10 }
 0x25f   : > { %1241 = shalt.err (!%p1238_p3)
}
 0x260   : > { %1058 = dma.vmem_to_hbm [thread:$0]  (%p1586_p0), %s1525_s7, 128, %s1523_s8, %s731_s9  }
 0x261 PF: > { %s756_s12 = sand.u32 1, %s1272_s18   ;;  %p1587_p5 = scmp.ne.s32.totalorder %s1577_s25, 0 }
 0x262   : > { %p1588_p9 = scmp.ge.s32.totalorder %s1284_s21, 2  ;;  %s757_s13 = scalar_lea.sflag [#allocation4], %s756_s12 }
 0x264   : > { %p1072_p12 = pnand %p1588_p9, %p1587_p5 }
 0x266   : > { %1267 = dma.done.wait (!%p1072_p12), %s757_s13, 128  }
 0x267   : > { %1269 = vsyncadd (!%p1072_p12), %s757_s13, 4294967168  ;;  %p19_p2 = scmp.ge.s32.totalorder %s1435_s16, 4   ;;  %s1589_s18 = smov %s1276_s19 }
 0x268   : > { %s1590_s19 = smov %s1280_s20  ;;  %s1591_s20 = smov %s1444_s27 }
 0x269   : > { %s1592_s21 = smov %s1435_s16  ;;  %21 = sbr.rel (!%p19_p2) target bundleno = 6 (0x6), region = 93 }
 0x270   :  { %762 = vsyncpa [#allocation3], 1 }
 0x271   :  { %764 = vsyncpa [#allocation3 + $0x1], 1 }
 0x272   :  { %765 = vsyncpa [#allocation6], 1 }
 0x273   :  { %766 = vsyncpa [#allocation4], 1 }
 0x274   :  { %768 = vsyncpa [#allocation4 + $0x1], 1 }

</bundles_post_ra>
